<compile_context>
chip_gen: v5e
topology: v5e:2x2
jax: 0.10.0
libtpu: 0.0.40
codegen_flags: <defaults>
</compile_context>

<pallas_src>
from typing import NamedTuple

import jax
import jax.numpy as jnp
from jax.experimental import pallas as pl
from jax.experimental.pallas import tpu as pltpu

HIDDEN = 256


def _round_up(n, m):
    return (n + m - 1) // m * m


class PackedParams(NamedTuple):
    """Kernel-ready, head-stacked parameters (pack once per param update)."""
    w1x: jax.Array   # (H, obs_dim, HIDDEN)  bf16
    w1a: jax.Array   # (H, act_dim, HIDDEN)  bf16
    b1:  jax.Array   # (H, 1, HIDDEN)        f32
    w2:  jax.Array   # (H, HIDDEN, HIDDEN)   bf16
    b2:  jax.Array   # (H, 1, HIDDEN)        f32
    w3:  jax.Array   # (H, 1, HIDDEN)        f32 (fc3 weight as a row)
    b3:  jax.Array   # (H, 1)                f32 (SMEM scalar)


def pack_params(param_sets, obs_dim, *, compute_dtype=jnp.bfloat16):
    """Pack one or more (w1, b1, w2, b2, w3, b3) tuples into PackedParams.

    Hoisted out of the per-call path so the pallas_call is the only op on the
    critic forward.  `param_sets` may be a single tuple or a list of tuples
    (e.g. [qf1_params, qf2_params] for the fused SAC twin critics).
    """
    if isinstance(param_sets, (list, tuple)) and hasattr(param_sets[0], "shape"):
        param_sets = [param_sets]
    w1x, w1a, b1, w2, b2, w3, b3 = [], [], [], [], [], [], []
    for (w1_, b1_, w2_, b2_, w3_, b3_) in param_sets:
        w1x.append(w1_[:obs_dim].astype(compute_dtype))
        w1a.append(w1_[obs_dim:].astype(compute_dtype))
        b1.append(b1_.reshape(1, HIDDEN).astype(jnp.float32))
        w2.append(w2_.astype(compute_dtype))
        b2.append(b2_.reshape(1, HIDDEN).astype(jnp.float32))
        w3.append(w3_.reshape(1, HIDDEN).astype(jnp.float32))
        b3.append(b3_.reshape(1).astype(jnp.float32))
    return PackedParams(
        w1x=jnp.stack(w1x), w1a=jnp.stack(w1a), b1=jnp.stack(b1),
        w2=jnp.stack(w2), b2=jnp.stack(b2), w3=jnp.stack(w3), b3=jnp.stack(b3))


def softq_kernel(x_ref, a_ref, w1x_ref, w1a_ref, b1_ref, w2_ref, b2_ref,
                 w3_ref, b3_ref, o_ref):
    # fc1: split-K matmul over the separate x / a tiles (the torch.cat is fused
    # away); bf16 operands on the MXU, f32 accumulation, f32 bias + ReLU.
    h1 = (jnp.dot(x_ref[...], w1x_ref[...], preferred_element_type=jnp.float32)
          + jnp.dot(a_ref[...], w1a_ref[...], preferred_element_type=jnp.float32)
          + b1_ref[...])
    h1 = jnp.maximum(h1, 0.0)
    # fc2: bf16 operands, f32 accumulation.
    h2 = jnp.dot(h1.astype(w2_ref.dtype), w2_ref[...],
                 preferred_element_type=jnp.float32) + b2_ref[...]
    h2 = jnp.maximum(h2, 0.0)
    # fc3: output width 1 -> VPU multiply + lane (XLU) reduction in f32;
    # b3 is an SMEM scalar.
    o_ref[...] = jnp.sum(h2 * w3_ref[...], axis=-1, keepdims=True) + b3_ref[0, 0]


def softq_forward(x, a, packed, *, tile_b=512):
    """Q(x, a) for H stacked critics sharing one pallas_call.

    Returns (B, 1) if H == 1 (exact SoftQNetwork semantics), else (H, B, 1).
    """
    B, obs_dim = x.shape
    act_dim = a.shape[1]
    H = packed.w2.shape[0]
    in1 = obs_dim + act_dim
    assert packed.w1x.shape[1] == obs_dim and packed.w1a.shape[1] == act_dim
    cdtype = packed.w1x.dtype

    # --- batch tiling: multiple of 8 (sublane); >= 2 tiles when B > 8 so the
    # "parallel" batch axis can be sharded across both v7x TensorCores. -------
    tile_b = min(tile_b, _round_up(B, 8))
    if B > 8:
        tile_b = min(tile_b, _round_up((B + 1) // 2, 8))
    tile_b = max(8, _round_up(tile_b, 8))
    b_pad = _round_up(B, tile_b)
    grid_b = b_pad // tile_b

    # Cast MXU operands to bf16 and pad the batch with zero rows (sliced off
    # at the end).  No [x|a] concat, no lane padding.
    xb = x.astype(cdtype)
    ab = a.astype(cdtype)
    if b_pad != B:
        xb = jnp.pad(xb, ((0, b_pad - B), (0, 0)))
        ab = jnp.pad(ab, ((0, b_pad - B), (0, 0)))

    # VMEM budget: double-buffered x/a/out tiles + per-head weights + headroom
    # for the (tile_b, HIDDEN) f32 intermediates.
    bpw = jnp.dtype(cdtype).itemsize
    w_bytes = bpw * (in1 * HIDDEN + HIDDEN * HIDDEN) + 4 * (3 * HIDDEN + 1)
    io_bytes = bpw * tile_b * in1 + 4 * tile_b
    scratch_bytes = 2 * 4 * tile_b * HIDDEN
    vmem_limit = int(min(max(2 * (w_bytes + io_bytes) + scratch_bytes, 16 << 20),
                         64 << 20))

    cost = pl.CostEstimate(
        flops=2 * b_pad * H * (in1 * HIDDEN + HIDDEN * HIDDEN + HIDDEN),
        transcendentals=0,
        bytes_accessed=int(bpw * b_pad * in1
                           + H * (bpw * (in1 + HIDDEN) * HIDDEN
                                  + 4 * (3 * HIDDEN + 1))
                           + 4 * b_pad * H),
    )

    out = pl.pallas_call(
        softq_kernel,
        out_shape=jax.ShapeDtypeStruct((H, b_pad, 1), jnp.float32),
        grid=(grid_b, H),
        in_specs=[
            pl.BlockSpec((tile_b, obs_dim), lambda i, h: (i, 0)),           # x tile
            pl.BlockSpec((tile_b, act_dim), lambda i, h: (i, 0)),           # a tile
            pl.BlockSpec((None, obs_dim, HIDDEN), lambda i, h: (h, 0, 0)),  # W1[:obs]
            pl.BlockSpec((None, act_dim, HIDDEN), lambda i, h: (h, 0, 0)),  # W1[obs:]
            pl.BlockSpec((None, 1, HIDDEN), lambda i, h: (h, 0, 0)),        # b1
            pl.BlockSpec((None, HIDDEN, HIDDEN), lambda i, h: (h, 0, 0)),   # W2
            pl.BlockSpec((None, 1, HIDDEN), lambda i, h: (h, 0, 0)),        # b2
            pl.BlockSpec((None, 1, HIDDEN), lambda i, h: (h, 0, 0)),        # w3 row
            pl.BlockSpec((1, 1), lambda i, h: (h, 0),
                         memory_space=pltpu.MemorySpace.SMEM),              # b3 scalar
        ],
        out_specs=pl.BlockSpec((None, tile_b, 1), lambda i, h: (h, i, 0)),
        compiler_params=pltpu.CompilerParams(
            dimension_semantics=("parallel", "arbitrary"),
            vmem_limit_bytes=vmem_limit,
        ),
        cost_estimate=cost,
    )(xb, ab, packed.w1x, packed.w1a, packed.b1, packed.w2, packed.b2,
      packed.w3, packed.b3)

    if H == 1:
        return out[0, :B]
    return out[:, :B]


def init_params(key, obs_dim, act_dim):
    """Deterministic init mimicking nn.Linear default U(-1/sqrt(fan_in), ...)."""
    ks = jax.random.split(key, 6)
    in1 = obs_dim + act_dim

    def u(k, shape, fan_in):
        bound = 1.0 / jnp.sqrt(jnp.float32(fan_in))
        return jax.random.uniform(k, shape, jnp.float32, -bound, bound)

    w1 = u(ks[0], (in1, HIDDEN), in1)        # stored (in, out)
    b1 = u(ks[1], (1, HIDDEN), in1)
    w2 = u(ks[2], (HIDDEN, HIDDEN), HIDDEN)
    b2 = u(ks[3], (1, HIDDEN), HIDDEN)
    w3 = u(ks[4], (HIDDEN, 1), HIDDEN)
    b3 = u(ks[5], (1, 1), HIDDEN)
    return (w1, b1, w2, b2, w3, b3)


def reference_forward(x, a, params):
    """Plain-JAX f32 reference of the PyTorch forward (sanity check)."""
    w1, b1, w2, b2, w3, b3 = params
    xa = jnp.concatenate([x, a], axis=1)
    h1 = jax.nn.relu(xa @ w1 + b1)
    h2 = jax.nn.relu(h1 @ w2 + b2)
    return h2 @ w3 + b3


if __name__ == "__main__":
    key = jax.random.PRNGKey(0)
    k_p, k_p2, k_x, k_a = jax.random.split(key, 4)

    batch, obs_dim, act_dim = 8, 16, 8
    params = init_params(k_p, obs_dim, act_dim)
    x = jax.random.normal(k_x, (batch, obs_dim), jnp.float32)
    a = jax.random.normal(k_a, (batch, act_dim), jnp.float32)

    # Single critic (H = 1): exactly the PyTorch SoftQNetwork forward.
    packed = pack_params([params], obs_dim)
    q = softq_forward(x, a, packed)
    jax.block_until_ready(q)

    q_ref = reference_forward(x, a, params)
    assert q.shape == (batch, 1)
    # bf16 MXU operands with f32 accumulation -> loosened tolerance vs f32 ref.
    assert jnp.allclose(q, q_ref, atol=5e-2, rtol=5e-2), \
        float(jnp.max(jnp.abs(q - q_ref)))

    # SAC twin-critic fusion (H = 2): both Q heads in one pallas_call sharing
    # the x/a tiles.
    params2 = init_params(k_p2, obs_dim, act_dim)
    packed2 = pack_params([params, params2], obs_dim)
    q12 = softq_forward(x, a, packed2)
    jax.block_until_ready(q12)

    q2_ref = reference_forward(x, a, params2)
    assert q12.shape == (2, batch, 1)
    assert jnp.allclose(q12[0], q_ref, atol=5e-2, rtol=5e-2)
    assert jnp.allclose(q12[1], q2_ref, atol=5e-2, rtol=5e-2)

    print("KERNEL_OK")
</pallas_src>

<mosaic_0001>
module attributes {stable_mosaic.version = 11 : i64} {
  func.func @softq_kernel(%arg0: i32, %arg1: i32, %arg2: memref<8x16xbf16, #tpu.memory_space<vmem>>, %arg3: memref<8x8xbf16, #tpu.memory_space<vmem>>, %arg4: memref<1x16x256xbf16, #tpu.memory_space<vmem>>, %arg5: memref<1x8x256xbf16, #tpu.memory_space<vmem>>, %arg6: memref<1x1x256xf32, #tpu.memory_space<vmem>>, %arg7: memref<1x256x256xbf16, #tpu.memory_space<vmem>>, %arg8: memref<1x1x256xf32, #tpu.memory_space<vmem>>, %arg9: memref<1x1x256xf32, #tpu.memory_space<vmem>>, %arg10: memref<1x1xf32, #tpu.memory_space<smem>>, %arg11: memref<1x8x1xf32, #tpu.memory_space<vmem>>) attributes {dimension_semantics = [#tpu.dimension_semantics<parallel>, #tpu.dimension_semantics<arbitrary>], iteration_bounds = array<i64: 1, 1>, scalar_prefetch = 0 : i64, scratch_operands = 0 : i64, tpu.core_type = #tpu.core_type<tc>, window_params = [{transform_indices = @transform_0, window_bounds = array<i64: 8, 16>}, {transform_indices = @transform_1, window_bounds = array<i64: 8, 8>}, {transform_indices = @transform_2, window_bounds = array<i64: 1, 16, 256>}, {transform_indices = @transform_3, window_bounds = array<i64: 1, 8, 256>}, {transform_indices = @transform_4, window_bounds = array<i64: 1, 1, 256>}, {transform_indices = @transform_5, window_bounds = array<i64: 1, 256, 256>}, {transform_indices = @transform_6, window_bounds = array<i64: 1, 1, 256>}, {transform_indices = @transform_7, window_bounds = array<i64: 1, 1, 256>}, {transform_indices = @transform_8, window_bounds = array<i64: 1, 1>}, {transform_indices = @transform_9, window_bounds = array<i64: 1, 8, 1>}]} {
    %c0 = arith.constant 0 : index
    %c0_0 = arith.constant 0 : index
    %0 = vector.load %arg2[%c0, %c0_0] : memref<8x16xbf16, #tpu.memory_space<vmem>>, vector<8x16xbf16>
    %c0_1 = arith.constant 0 : index
    %c0_2 = arith.constant 0 : index
    %c0_3 = arith.constant 0 : index
    %1 = vector.load %arg4[%c0_1, %c0_2, %c0_3] : memref<1x16x256xbf16, #tpu.memory_space<vmem>>, vector<1x16x256xbf16>
    %2 = vector.shape_cast %1 : vector<1x16x256xbf16> to vector<16x256xbf16>
    %cst = arith.constant dense<0.000000e+00> : vector<8x256xf32>
    %3 = tpu.matmul %0, %2, %cst {dimension_numbers = #tpu.dot_dimension_numbers<[1], [0], [0], [1], [0, 0, 1, 1], [], []>} : vector<8x16xbf16>, vector<16x256xbf16>, vector<8x256xf32> -> vector<8x256xf32>
    %c0_4 = arith.constant 0 : index
    %c0_5 = arith.constant 0 : index
    %4 = vector.load %arg3[%c0_4, %c0_5] : memref<8x8xbf16, #tpu.memory_space<vmem>>, vector<8x8xbf16>
    %c0_6 = arith.constant 0 : index
    %c0_7 = arith.constant 0 : index
    %c0_8 = arith.constant 0 : index
    %5 = vector.load %arg5[%c0_6, %c0_7, %c0_8] : memref<1x8x256xbf16, #tpu.memory_space<vmem>>, vector<1x8x256xbf16>
    %6 = vector.shape_cast %5 : vector<1x8x256xbf16> to vector<8x256xbf16>
    %cst_9 = arith.constant dense<0.000000e+00> : vector<8x256xf32>
    %7 = tpu.matmul %4, %6, %cst_9 {dimension_numbers = #tpu.dot_dimension_numbers<[1], [0], [0], [1], [0, 0, 1, 1], [], []>} : vector<8x8xbf16>, vector<8x256xbf16>, vector<8x256xf32> -> vector<8x256xf32>
    %8 = arith.addf %3, %7 : vector<8x256xf32>
    %c0_10 = arith.constant 0 : index
    %c0_11 = arith.constant 0 : index
    %c0_12 = arith.constant 0 : index
    %9 = vector.load %arg6[%c0_10, %c0_11, %c0_12] : memref<1x1x256xf32, #tpu.memory_space<vmem>>, vector<1x1x256xf32>
    %10 = vector.shape_cast %9 : vector<1x1x256xf32> to vector<1x256xf32>
    %11 = vector.broadcast %10 : vector<1x256xf32> to vector<8x256xf32>
    %12 = arith.addf %8, %11 : vector<8x256xf32>
    %cst_13 = arith.constant 0.000000e+00 : f32
    %13 = vector.broadcast %cst_13 : f32 to vector<8x256xf32>
    %14 = arith.maximumf %12, %13 : vector<8x256xf32>
    %15 = arith.truncf %14 : vector<8x256xf32> to vector<8x256xbf16>
    %c0_14 = arith.constant 0 : index
    %c0_15 = arith.constant 0 : index
    %c0_16 = arith.constant 0 : index
    %16 = vector.load %arg7[%c0_14, %c0_15, %c0_16] : memref<1x256x256xbf16, #tpu.memory_space<vmem>>, vector<1x256x256xbf16>
    %17 = vector.shape_cast %16 : vector<1x256x256xbf16> to vector<256x256xbf16>
    %cst_17 = arith.constant dense<0.000000e+00> : vector<8x256xf32>
    %18 = tpu.matmul %15, %17, %cst_17 {dimension_numbers = #tpu.dot_dimension_numbers<[1], [0], [0], [1], [0, 0, 1, 1], [], []>} : vector<8x256xbf16>, vector<256x256xbf16>, vector<8x256xf32> -> vector<8x256xf32>
    %c0_18 = arith.constant 0 : index
    %c0_19 = arith.constant 0 : index
    %c0_20 = arith.constant 0 : index
    %19 = vector.load %arg8[%c0_18, %c0_19, %c0_20] : memref<1x1x256xf32, #tpu.memory_space<vmem>>, vector<1x1x256xf32>
    %20 = vector.shape_cast %19 : vector<1x1x256xf32> to vector<1x256xf32>
    %21 = vector.broadcast %20 : vector<1x256xf32> to vector<8x256xf32>
    %22 = arith.addf %18, %21 : vector<8x256xf32>
    %cst_21 = arith.constant 0.000000e+00 : f32
    %23 = vector.broadcast %cst_21 : f32 to vector<8x256xf32>
    %24 = arith.maximumf %22, %23 : vector<8x256xf32>
    %c0_22 = arith.constant 0 : index
    %c0_23 = arith.constant 0 : index
    %c0_24 = arith.constant 0 : index
    %25 = vector.load %arg9[%c0_22, %c0_23, %c0_24] : memref<1x1x256xf32, #tpu.memory_space<vmem>>, vector<1x1x256xf32>
    %26 = vector.shape_cast %25 : vector<1x1x256xf32> to vector<1x256xf32>
    %27 = vector.broadcast %26 : vector<1x256xf32> to vector<8x256xf32>
    %28 = arith.mulf %24, %27 : vector<8x256xf32>
    %cst_25 = arith.constant dense<0.000000e+00> : vector<8xf32>
    %29 = vector.multi_reduction <add>, %28, %cst_25 [1] : vector<8x256xf32> to vector<8xf32>
    %30 = vector.shape_cast %29 : vector<8xf32> to vector<8x1xf32>
    %c0_26 = arith.constant 0 : index
    %c0_27 = arith.constant 0 : index
    %31 = memref.load %arg10[%c0_26, %c0_27] : memref<1x1xf32, #tpu.memory_space<smem>>
    %32 = vector.broadcast %31 : f32 to vector<8x1xf32>
    %33 = arith.addf %30, %32 : vector<8x1xf32>
    %c0_28 = arith.constant 0 : index
    %c0_29 = arith.constant 0 : index
    %c0_30 = arith.constant 0 : index
    %34 = vector.load %arg11[%c0_28, %c0_29, %c0_30] : memref<1x8x1xf32, #tpu.memory_space<vmem>>, vector<1x8x1xf32>
    %35 = vector.shape_cast %34 : vector<1x8x1xf32> to vector<8x1xf32>
    %36 = vector.shape_cast %33 : vector<8x1xf32> to vector<1x8x1xf32>
    tpu.vector_store %arg11[%c0_28, %c0_29, %c0_30], %36 {strides = array<i32>} : memref<1x8x1xf32, #tpu.memory_space<vmem>>, vector<1x8x1xf32>,
    return
  }
  func.func @transform_0(%arg0: i32, %arg1: i32) -> (i32, i32) {
    %c0_i32 = arith.constant 0 : i32
    %c0_i32_0 = arith.constant 0 : i32
    return %arg0, %c0_i32 : i32, i32
  }
  func.func @transform_1(%arg0: i32, %arg1: i32) -> (i32, i32) {
    %c0_i32 = arith.constant 0 : i32
    %c0_i32_0 = arith.constant 0 : i32
    return %arg0, %c0_i32 : i32, i32
  }
  func.func @transform_2(%arg0: i32, %arg1: i32) -> (i32, i32, i32) {
    %c0_i32 = arith.constant 0 : i32
    %c0_i32_0 = arith.constant 0 : i32
    %c0_i32_1 = arith.constant 0 : i32
    return %arg1, %c0_i32, %c0_i32_0 : i32, i32, i32
  }
  func.func @transform_3(%arg0: i32, %arg1: i32) -> (i32, i32, i32) {
    %c0_i32 = arith.constant 0 : i32
    %c0_i32_0 = arith.constant 0 : i32
    %c0_i32_1 = arith.constant 0 : i32
    return %arg1, %c0_i32, %c0_i32_0 : i32, i32, i32
  }
  func.func @transform_4(%arg0: i32, %arg1: i32) -> (i32, i32, i32) {
    %c0_i32 = arith.constant 0 : i32
    %c0_i32_0 = arith.constant 0 : i32
    %c0_i32_1 = arith.constant 0 : i32
    return %arg1, %c0_i32, %c0_i32_0 : i32, i32, i32
  }
  func.func @transform_5(%arg0: i32, %arg1: i32) -> (i32, i32, i32) {
    %c0_i32 = arith.constant 0 : i32
    %c0_i32_0 = arith.constant 0 : i32
    %c0_i32_1 = arith.constant 0 : i32
    return %arg1, %c0_i32, %c0_i32_0 : i32, i32, i32
  }
  func.func @transform_6(%arg0: i32, %arg1: i32) -> (i32, i32, i32) {
    %c0_i32 = arith.constant 0 : i32
    %c0_i32_0 = arith.constant 0 : i32
    %c0_i32_1 = arith.constant 0 : i32
    return %arg1, %c0_i32, %c0_i32_0 : i32, i32, i32
  }
  func.func @transform_7(%arg0: i32, %arg1: i32) -> (i32, i32, i32) {
    %c0_i32 = arith.constant 0 : i32
    %c0_i32_0 = arith.constant 0 : i32
    %c0_i32_1 = arith.constant 0 : i32
    return %arg1, %c0_i32, %c0_i32_0 : i32, i32, i32
  }
  func.func @transform_8(%arg0: i32, %arg1: i32) -> (i32, i32) {
    %c0_i32 = arith.constant 0 : i32
    %c0_i32_0 = arith.constant 0 : i32
    return %arg1, %c0_i32 : i32, i32
  }
  func.func @transform_9(%arg0: i32, %arg1: i32) -> (i32, i32, i32) {
    %c0_i32 = arith.constant 0 : i32
    %c0_i32_0 = arith.constant 0 : i32
    return %arg1, %arg0, %c0_i32 : i32, i32, i32
  }
}

</mosaic_0001>

<bundles_post_ra>
// kernel: tpu_custom_call.1
= control target key start
LH: loop header
LB: loop body
LE: loop exit
PB: predicated region body
PF: predicated region fallthrough
CT: control target
= control target key end

     0   :  { %15 = vsyncpa [#allocation4], 0  ;;  %s880_s0 = inlined_call_operand.hbm [shape: bf16[8,16], index: 0, kind: input, shape index: {}]   ;;  %s881_s1 = inlined_call_operand.hbm [shape: bf16[8,8], index: 1, kind: input, shape index: {}]   ;;  %s882_s2 = inlined_call_operand.hbm [shape: bf16[1,16,256], index: 2, kind: input, shape index: {}]   ;;  %s883_s3 = inlined_call_operand.hbm [shape: bf16[1,8,256], index: 3, kind: input, shape index: {}]   ;;  %s884_s4 = inlined_call_operand.vmem [shape: f32[1,1,256], index: 4, kind: input, shape index: {}]   ;;  %s885_s5 = inlined_call_operand.hbm [shape: bf16[1,256,256], index: 5, kind: input, shape index: {}]   ;;  %s886_s6 = inlined_call_operand.vmem [shape: f32[1,1,256], index: 6, kind: input, shape index: {}]   ;;  %s887_s7 = inlined_call_operand.vmem [shape: f32[1,1,256], index: 7, kind: input, shape index: {}]   ;;  %s888_s8 = inlined_call_operand.<no memory space> [shape: f32[1,1], index: 8, kind: input, shape index: {}]   ;;  %s889_s9 = inlined_call_operand.vmem [shape: f32[1,8,1], index: 9, kind: output, shape index: {}]  }
   0x1   :  { %16 = vsyncpa [#allocation6], 0  ;;  %s34_s11 = sshll.u32 %s881_s1, 4  ;;  %s35_s11 = int_to_ptr.hbm [resolvable:$true] %s34_s11 }
   0x2   :  { %17 = vsyncpa [#allocation9], 0  ;;  %s787_s12 = smov [#allocation5]   ;;  %s58_s16 = sshll.u32 %s883_s3, 4  ;;  %s59_s16 = int_to_ptr.hbm [resolvable:$true] %s58_s16 }
   0x3   :  { %s36_s13 = sshll.u32 %s787_s12, 4  ;;  %s788_s17 = smov [#allocation8]   ;;  %s37_s13 = int_to_ptr.vmem [resolvable:$true] %s36_s13 }
   0x4   :  { %39 = dma.hbm_to_vmem [thread:$0]  %s35_s11, 64, %s37_s13, [#allocation6]  }
   0x5   :  { %s60_s18 = sshll.u32 %s788_s17, 4  ;;  %s23_s21 = sshll.u32 %s880_s0, 4  ;;  %s61_s18 = int_to_ptr.vmem [resolvable:$true] %s60_s18  ;;  %s24_s21 = int_to_ptr.hbm [resolvable:$true] %s23_s21 }
   0x6   :  { %63 = dma.hbm_to_vmem [thread:$0]  %s59_s16, 128, %s61_s18, [#allocation9]  }
   0x7   :  { %s44_s23 = sshll.u32 %s882_s2, 4  ;;  %s789_s24 = smov [#allocation3]   ;;  %s45_s23 = int_to_ptr.hbm [resolvable:$true] %s44_s23 }
   0x8   :  { %s25_s25 = sshll.u32 %s789_s24, 4  ;;  %s790_s3 = smov [#allocation7]   ;;  %s26_s25 = int_to_ptr.vmem [resolvable:$true] %s25_s25 }
   0x9   :  { %28 = dma.hbm_to_vmem [thread:$0]  %s24_s21, 64, %s26_s25, [#allocation4]  }
   0xa   :  { %s46_s26 = sshll.u32 %s790_s3, 4  ;;  %s791_s27 = smov 128   ;;  %s47_s26 = int_to_ptr.vmem [resolvable:$true] %s46_s26 }
   0xb   :  { %s792_s28 = smov 8   ;;  %s70_s30 = sshll.u32 %s885_s5, 4  ;;  %s71_s30 = int_to_ptr.hbm [resolvable:$true] %s70_s30 }
   0xc   :  { %52 = dma.hbm_to_vmem [thread:$0]  %s45_s23, 256, %s47_s26, [#allocation6], %s791_s27, %s791_s27, %s792_s28  }
   0xd   :  { %s793_s10 = smov [#allocation10]  }
   0xe   :  { %s72_s11 = sshll.u32 %s793_s10, 4  ;;  %s73_s11 = int_to_ptr.vmem [resolvable:$true] %s72_s11 }
   0xf   :  { %78 = dma.hbm_to_vmem [thread:$0]  %s71_s30, 4096, %s73_s11, [#allocation9], %s791_s27, %s791_s27, %s792_s28  }
  0x10   :  { %781 = dma.done.wait [#allocation4], 64  }
  0x11   :  { %782 = vsyncadd [#allocation4], 4294967232 }
  0x12   :  { %783 = dma.done.wait [#allocation6], 320  }
  0x13   :  { %784 = vsyncadd [#allocation6], 4294966976 }
  0x14   :  { %785 = dma.done.wait [#allocation9], 4224  }
  0x15   :  { %786 = vsyncadd [#allocation9], 4294963072  ;;  %v484_v0 = vld [vmem:[#allocation7] sm:$0xf]  ;;  %v621_v1 = vld [vmem:[#allocation7 + $0x4] sm:$0xf0] }
  0x16   :  { %v620_v2 = vld [vmem:[#allocation7 + $0x4] sm:$0xf]  ;;  %v485_v3 = vor.u32 %v621_v1, %v484_v0  ;;  %v486_v4 = vld [vmem:[#allocation7 + $0x8] sm:$0xf0]  ;;  %v110_v5 = vld [vmem:[#allocation8] sm:$0xff]  ;;  %vm120_vm0 = vcmask 1043456  }
  0x17   :  { %vm163_vm1 = vcmask 130048   ;;  %v489_v6 = vor.u32 %v620_v2, %v486_v4  ;;  %v112_v7 = vunpack.c.l.b16 %v110_v5  ;;  %v113_v8 = vunpack.c.h.b16 %v110_v5  ;;  %v106_v9 = vld [vmem:[#allocation3] sm:$0xf]  ;;  %v550_v10 = vld [vmem:[#allocation10 + $0x70] sm:$0xf] }
  0x18   :  { %v637_v11 = vld [vmem:[#allocation10 + $0x74] sm:$0xf0]  ;;  %174 = vmatpush.bf16.msra.mxu2 %v485_v3  ;;  %v614_v12 = vld [vmem:[#allocation10 + $0xf0] sm:$0xf]  ;;  %v636_v14 = vld [vmem:[#allocation10 + $0x74] sm:$0xf] }
  0x19   :  { %v653_v13 = vld [vmem:[#allocation10 + $0xf4] sm:$0xf0]  ;;  %187 = vmatpush.bf16.msra.mxu3 %v489_v6  ;;  %v114_v15 = vpack.c.b16 %v112_v7, %v112_v7  ;;  %v115_v16 = vpack.c.b16 %v113_v8, %v113_v8  ;;  %v551_v17 = vor.u32 %v637_v11, %v550_v10  ;;  %v552_v18 = vld [vmem:[#allocation10 + $0x78] sm:$0xf0]  ;;  %v652_v19 = vld [vmem:[#allocation10 + $0xf4] sm:$0xf] }
  0x1a   :  { %v616_v20 = vld [vmem:[#allocation10 + $0xf8] sm:$0xf0]  ;;  %v615_v21 = vor.u32 %v653_v13, %v614_v12  ;;  %v555_v22 = vor.u32 %v636_v14, %v552_v18  ;;  %v542_v23 = vld [vmem:[#allocation10 + $0x60] sm:$0xf]  ;;  %v635_v24 = vld [vmem:[#allocation10 + $0x64] sm:$0xf0] }
  0x1b   :  { %v606_v25 = vld [vmem:[#allocation10 + $0xe0] sm:$0xf]  ;;  %v122_v26 = vsel %vm120_vm0, %v114_v15, 0  ;;  %v125_v27 = vsel %vm120_vm0, %v115_v16, 0  ;;  %490 = vmatmul.msk.bf16.vlgmr.msra.gmra.mxu2 %vm163_vm1, %v106_v9  ;;  %v651_v28 = vld [vmem:[#allocation10 + $0xe4] sm:$0xf0]  ;;  %v619_v31 = vor.u32 %v652_v19, %v616_v20  ;;  %v543_v33 = vor.u32 %v635_v24, %v542_v23 }
  0x1c   :  { %v634_v29 = vld [vmem:[#allocation10 + $0x64] sm:$0xf]  ;;  %134 = vmatpush.bf16.msra.mxu0 %v122_v26  ;;  %147 = vmatpush.bf16.msra.mxu1 %v125_v27  ;;  %vm116_vm2 = vcmask 64512   ;;  %v544_v32 = vld [vmem:[#allocation10 + $0x68] sm:$0xf0]  ;;  %v607_v36 = vor.u32 %v651_v28, %v606_v25  ;;  %vm471_vm3 = vcmask 7168  }
  0x1d   :  { %v109_v30 = vld [vmem:[#allocation5] sm:$0xf]  ;;  %491 = vmatmul.msk.bf16.vlgmr.msra.gmra.mxu3 %vm163_vm1, %v106_v9  ;;  %v608_v35 = vld [vmem:[#allocation10 + $0xe8] sm:$0xf0]  ;;  %429 = vmatpush.bf16.msrb.mxu2 %v555_v22  ;;  %v547_v37 = vor.u32 %v634_v29, %v544_v32  ;;  %v534_v38 = vld [vmem:[#allocation10 + $0x50] sm:$0xf] }
  0x1e   :  { %v650_v34 = vld [vmem:[#allocation10 + $0xe4] sm:$0xf]  ;;  %v633_v39 = vld [vmem:[#allocation10 + $0x54] sm:$0xf0]  ;;  %v598_v40 = vld [vmem:[#allocation10 + $0xd0] sm:$0xf]  ;;  %442 = vmatpush.bf16.msrb.mxu3 %v619_v31 }
  0x1f   :  { %480 = vmatmul.msk.bf16.vlgmr.msra.gmra.mxu0 %vm116_vm2, %v109_v30  ;;  %481 = vmatmul.msk.bf16.vlgmr.msra.gmra.mxu1 %vm116_vm2, %v109_v30  ;;  %v649_v41 = vld [vmem:[#allocation10 + $0xd4] sm:$0xf0]  ;;  %v632_v42 = vld [vmem:[#allocation10 + $0x54] sm:$0xf]  ;;  %v536_v43 = vld [vmem:[#allocation10 + $0x58] sm:$0xf0]  ;;  %v611_v44 = vor.u32 %v650_v34, %v608_v35  ;;  %v535_v45 = vor.u32 %v633_v39, %v534_v38 }
  0x20   :  { %403 = vmatpush.bf16.msrb.mxu0 %v551_v17  ;;  %416 = vmatpush.bf16.msrb.mxu1 %v615_v21  ;;  %v648_v46 = vld [vmem:[#allocation10 + $0xd4] sm:$0xf]  ;;  %v600_v47 = vld [vmem:[#allocation10 + $0xd8] sm:$0xf0]  ;;  %v599_v48 = vor.u32 %v649_v41, %v598_v40  ;;  %v539_v49 = vor.u32 %v632_v42, %v536_v43  ;;  %v526_v50 = vld [vmem:[#allocation10 + $0x40] sm:$0xf] }
  0x21   :  { %430 = vmatpush.bf16.msrb.mxu2 %v547_v37  ;;  %v631_v51 = vld [vmem:[#allocation10 + $0x44] sm:$0xf0]  ;;  %v590_v52 = vld [vmem:[#allocation10 + $0xc0] sm:$0xf]  ;;  %v630_v54 = vld [vmem:[#allocation10 + $0x44] sm:$0xf]  ;;  %v603_v56 = vor.u32 %v648_v46, %v600_v47 }
  0x22   :  { %v647_v53 = vld [vmem:[#allocation10 + $0xc4] sm:$0xf0]  ;;  %v528_v55 = vld [vmem:[#allocation10 + $0x48] sm:$0xf0]  ;;  %443 = vmatpush.bf16.msrb.mxu3 %v611_v44  ;;  %v527_v57 = vor.u32 %v631_v51, %v526_v50  ;;  %v646_v58 = vld [vmem:[#allocation10 + $0xc4] sm:$0xf] }
  0x23   :  { %v592_v59 = vld [vmem:[#allocation10 + $0xc8] sm:$0xf0]  ;;  %v591_v60 = vor.u32 %v647_v53, %v590_v52  ;;  %v531_v61 = vor.u32 %v630_v54, %v528_v55  ;;  %v518_v62 = vld [vmem:[#allocation10 + $0x30] sm:$0xf]  ;;  %v629_v63 = vld [vmem:[#allocation10 + $0x34] sm:$0xf0] }
  0x24   :  { %404 = vmatpush.bf16.msrb.mxu0 %v543_v33  ;;  %417 = vmatpush.bf16.msrb.mxu1 %v607_v36  ;;  %v582_v0 = vld [vmem:[#allocation10 + $0xb0] sm:$0xf]  ;;  %v645_v1 = vld [vmem:[#allocation10 + $0xb4] sm:$0xf0]  ;;  %v628_v2 = vld [vmem:[#allocation10 + $0x34] sm:$0xf]  ;;  %v595_v4 = vor.u32 %v646_v58, %v592_v59  ;;  %v519_v5 = vor.u32 %v629_v63, %v518_v62 }
  0x25   :  { %431 = vmatpush.bf16.msrb.mxu2 %v539_v49  ;;  %v520_v3 = vld [vmem:[#allocation10 + $0x38] sm:$0xf0]  ;;  %v644_v6 = vld [vmem:[#allocation10 + $0xb4] sm:$0xf]  ;;  %v583_v8 = vor.u32 %v645_v1, %v582_v0  ;;  %v510_v11 = vld [vmem:[#allocation10 + $0x20] sm:$0xf] }
  0x26   :  { %444 = vmatpush.bf16.msrb.mxu3 %v603_v56  ;;  %v584_v7 = vld [vmem:[#allocation10 + $0xb8] sm:$0xf0]  ;;  %v523_v9 = vor.u32 %v628_v2, %v520_v3  ;;  %v627_v12 = vld [vmem:[#allocation10 + $0x24] sm:$0xf0]  ;;  %v574_v13 = vld [vmem:[#allocation10 + $0xa0] sm:$0xf] }
  0x27   :  { %v587_v10 = vor.u32 %v644_v6, %v584_v7  ;;  %v511_v14 = vor.u32 %v627_v12, %v510_v11  ;;  %v643_v15 = vld [vmem:[#allocation10 + $0xa4] sm:$0xf0]  ;;  %v626_v16 = vld [vmem:[#allocation10 + $0x24] sm:$0xf]  ;;  %v512_v17 = vld [vmem:[#allocation10 + $0x28] sm:$0xf0] }
  0x28   :  { %405 = vmatpush.bf16.msrb.mxu0 %v535_v45  ;;  %418 = vmatpush.bf16.msrb.mxu1 %v599_v48  ;;  %v575_v18 = vor.u32 %v643_v15, %v574_v13  ;;  %v515_v19 = vor.u32 %v626_v16, %v512_v17  ;;  %v642_v20 = vld [vmem:[#allocation10 + $0xa4] sm:$0xf]  ;;  %v576_v21 = vld [vmem:[#allocation10 + $0xa8] sm:$0xf0]  ;;  %v502_v23 = vld [vmem:[#allocation10 + $0x10] sm:$0xf] }
  0x29   :  { %432 = vmatpush.bf16.msrb.mxu2 %v531_v61  ;;  %v579_v22 = vor.u32 %v642_v20, %v576_v21  ;;  %v625_v24 = vld [vmem:[#allocation10 + $0x14] sm:$0xf0]  ;;  %v566_v26 = vld [vmem:[#allocation10 + $0x90] sm:$0xf]  ;;  %v624_v29 = vld [vmem:[#allocation10 + $0x14] sm:$0xf] }
  0x2a   :  { %445 = vmatpush.bf16.msrb.mxu3 %v595_v4  ;;  %v503_v25 = vor.u32 %v625_v24, %v502_v23  ;;  %v641_v27 = vld [vmem:[#allocation10 + $0x94] sm:$0xf0]  ;;  %v504_v30 = vld [vmem:[#allocation10 + $0x18] sm:$0xf0]  ;;  %v640_v32 = vld [vmem:[#allocation10 + $0x94] sm:$0xf] }
  0x2b   :  { %v567_v28 = vor.u32 %v641_v27, %v566_v26  ;;  %v507_v31 = vor.u32 %v624_v29, %v504_v30  ;;  %v568_v33 = vld [vmem:[#allocation10 + $0x98] sm:$0xf0]  ;;  %v494_v35 = vld [vmem:[#allocation10] sm:$0xf]  ;;  %v623_v36 = vld [vmem:[#allocation10 + $0x4] sm:$0xf0] }
  0x2c   :  { %406 = vmatpush.bf16.msrb.mxu0 %v527_v57  ;;  %419 = vmatpush.bf16.msrb.mxu1 %v591_v60  ;;  %v571_v34 = vor.u32 %v640_v32, %v568_v33  ;;  %v558_v37 = vld [vmem:[#allocation10 + $0x80] sm:$0xf]  ;;  %v495_v38 = vor.u32 %v623_v36, %v494_v35  ;;  %v639_v39 = vld [vmem:[#allocation10 + $0x84] sm:$0xf0]  ;;  %v622_v40 = vld [vmem:[#allocation10 + $0x4] sm:$0xf] }
  0x2d   :  { %433 = vmatpush.bf16.msrb.mxu2 %v523_v9  ;;  %v496_v41 = vld [vmem:[#allocation10 + $0x8] sm:$0xf0]  ;;  %v559_v42 = vor.u32 %v639_v39, %v558_v37  ;;  %v638_v44 = vld [vmem:[#allocation10 + $0x84] sm:$0xf]  ;;  %v193_v47 = vld [vmem:[%s884_s4] sm:$0x3] }
  0x2e   :  { %446 = vmatpush.bf16.msrb.mxu3 %v587_v10  ;;  %v499_v43 = vor.u32 %v622_v40, %v496_v41  ;;  %v560_v45 = vld [vmem:[#allocation10 + $0x88] sm:$0xf0]  ;;  %v195_v50 = vperm.slane %v193_v47, 0  ;;  %v196_v53 = vperm.slane %v193_v47, 1  ;;  %v237_v2 = vld [vmem:[%s886_s6] sm:$0x3] }
  0x2f   :  { %v563_v46 = vor.u32 %v638_v44, %v560_v45  ;;  %v239_v3 = vperm.slane %v237_v2, 0  ;;  %v240_v7 = vperm.slane %v237_v2, 1  ;;  %v457_v10 = vld [vmem:[%s887_s7] sm:$0x3] }
  0x30   :  { %407 = vmatpush.bf16.msrb.mxu0 %v519_v5  ;;  %420 = vmatpush.bf16.msrb.mxu1 %v583_v8  ;;  %v459_v16 = vperm.slane %v457_v10, 0  ;;  %v460_v17 = vperm.slane %v457_v10, 1 }
  0x31   :  { %434 = vmatpush.bf16.msrb.mxu2 %v515_v19 }
  0x32   :  { %447 = vmatpush.bf16.msrb.mxu3 %v579_v22 }
  0x34   :  { %408 = vmatpush.bf16.msrb.mxu0 %v511_v14  ;;  %421 = vmatpush.bf16.msrb.mxu1 %v575_v18 }
  0x35   :  { %435 = vmatpush.bf16.msrb.mxu2 %v507_v31 }
  0x36   :  { %448 = vmatpush.bf16.msrb.mxu3 %v571_v34 }
  0x38   :  { %409 = vmatpush.bf16.msrb.mxu0 %v503_v25  ;;  %422 = vmatpush.bf16.msrb.mxu1 %v567_v28  ;;  %v469_v25 = vstv %s888_s8 }
  0x39   :  { %436 = vmatpush.bf16.msrb.mxu2 %v499_v43 }
  0x3a   :  { %449 = vmatpush.bf16.msrb.mxu3 %v563_v46 }
  0x3c   :  { %410 = vmatpush.bf16.msrb.mxu0 %v495_v38  ;;  %423 = vmatpush.bf16.msrb.mxu1 %v559_v42 }
  0x9c   :  { %v136_v48 = vpop.f32.mrf.mxu0  ;;  %v149_v49 = vpop.f32.mrf.mxu1 }
  0x9e   :  { %v176_v51 = vpop.f32.mrf.mxu2 }
  0x9f   :  { %v177_v52 = vadd.f32 %v176_v51, %v136_v48 }
  0xa0   :  { %v189_v54 = vpop.f32.mrf.mxu3 }
  0xa1   :  { %v199_v55 = vadd.f32 %v195_v50, %v177_v52  ;;  %v190_v56 = vadd.f32 %v189_v54, %v149_v49 }
  0xa3   :  { %v201_v57 = vmax.f32 %v199_v55, 0.0  ;;  %v200_v58 = vadd.f32 %v196_v53, %v190_v56 }
  0xa4   :  { %v138_v59 = vpop.f32.mrf.mxu0  ;;  %v151_v60 = vpop.f32.mrf.mxu1 }
  0xa5   :  { %v203_v61 = vpack.c.bf16 %v201_v57, %v201_v57  ;;  %v202_v62 = vmax.f32 %v200_v58, 0.0 }
  0xa6   :  { %v178_v63 = vpop.f32.mrf.mxu2 }
  0xa7   :  { %v204_v0 = vpack.c.bf16 %v202_v62, %v202_v62  ;;  %411 = vmatmul.bf16.vlgmr.msrb.gmra.mxu0 %v203_v61  ;;  %437 = vmatmul.bf16.vlgmr.msrb.gmra.mxu2 %v203_v61 }
  0xa8   :  { %v191_v1 = vpop.f32.mrf.mxu3 }
  0xa9   :  { %424 = vmatmul.bf16.vlgmr.msrb.gmra.mxu1 %v204_v0  ;;  %450 = vmatmul.bf16.vlgmr.msrb.gmra.mxu3 %v204_v0 }
 0x124   :  { %v412_v4 = vpop.f32.mrf.mxu0 }
 0x125   :  { %v413_v5 = vadd.f32 %v412_v4, %v239_v3 }
 0x126   :  { %v425_v6 = vpop.f32.mrf.mxu1 }
 0x127   :  { %v426_v8 = vadd.f32 %v425_v6, %v413_v5 }
 0x129   :  { %v455_v14 = vmax.f32 %v426_v8, 0.0 }
 0x12a   :  { %v438_v9 = vpop.f32.mrf.mxu2 }
 0x12b   :  { %v439_v11 = vadd.f32 %v438_v9, %v240_v7  ;;  %v463_v20 = vmul.f32 %v459_v16, %v455_v14 }
 0x12c   :  { %v451_v12 = vpop.f32.mrf.mxu3  ;;  %v414_v13 = vpop.f32.mrf.mxu0 }
 0x12d   :  { %v452_v15 = vadd.f32 %v451_v12, %v439_v11 }
 0x12e   :  { %v427_v18 = vpop.f32.mrf.mxu1 }
 0x12f   :  { %v456_v19 = vmax.f32 %v452_v15, 0.0 }
 0x131   :  { %v464_v21 = vmul.f32 %v460_v17, %v456_v19 }
 0x132   :  { %v440_v22 = vpop.f32.mrf.mxu2 }
 0x133   :  { %v465_v23 = vadd.f32 %v464_v21, %v463_v20 }
 0x134   :  { %v453_v24 = vpop.f32.mrf.mxu3 }
 0x135   :  { %466 = vadd.xlane.f32.xlu0 %v465_v23 }
 0x1a8   :  { %v467_v26 = vpop.xlane.xlu0 %466 }
 0x1a9   :  { %v470_v27 = vadd.f32 %v469_v25, %v467_v26 }
 0x1ab   :  { %472 = vst.msk [vmem:[%s889_s9] sm:$0xff] %vm471_vm3, %v470_v27 }
 0x1ac   :  { %477 = vsyncpa [#allocation4], 1 }
 0x1ad   :  { %478 = vsyncpa [#allocation6], 1 }
 0x1ae   :  { %479 = vsyncpa [#allocation9], 1 }

</bundles_post_ra>
